<compile_context>
chip_gen: v7x
topology: tpu7x:2x2x1
jax: 0.10.0
libtpu: 0.0.40
codegen_flags: <defaults>
</compile_context>

<pallas_src>
import jax
import jax.numpy as jnp
import numpy as np
from jax.experimental import pallas as pl
from jax.experimental.pallas import tpu as pltpu

_LANE = 128
_SUBLANE = 8
_MAX_TILE_ROWS = 2048    # rows of 128 lanes per block -> 3 MiB per (3, R, 128) f32 block
_C = 3                   # channel count fixed by the module (reshape(B, 3, -1))


def _round_up(a, b):
    return (a + b - 1) // b * b


def _stats_kernel(x_ref, sum_ref, sq_ref, cnt_ref):
    """Pass 1: NaN-aware per-channel partial sums.

    x_ref:   (C, R_TILE, 128) f32 block of the packed (B, C, r_pad, 128) input.
    *_ref:   (C, 128) f32 per-batch partial outputs; the output block itself is
             the accumulator, resident across the m-axis (grid axis 1).
    """
    @pl.when(pl.program_id(1) == 0)
    def _init():
        sum_ref[...] = jnp.zeros_like(sum_ref)
        sq_ref[...] = jnp.zeros_like(sq_ref)
        cnt_ref[...] = jnp.zeros_like(cnt_ref)

    x = x_ref[...]                                   # (C, R_TILE, 128)
    nan = jnp.isnan(x)
    xz = jnp.where(nan, 0.0, x)
    valid = jnp.where(nan, 0.0, 1.0)

    # Sublane-axis reductions only; the tiny cross-lane + cross-batch combine
    # happens once in XLA on the (B, C, 128) partials.
    sum_ref[...] += jnp.sum(xz, axis=1)              # (C, 128)
    sq_ref[...] += jnp.sum(xz * xz, axis=1)
    cnt_ref[...] += jnp.sum(valid, axis=1)
    # NOTE: var = E[x^2] - mean^2 (single streaming pass); mild f32
    # cancellation risk when |mean| >> std.
    # TODO(synk): subtract a cheap per-channel shift before accumulating if
    # inputs can carry large offsets.


def _normalize_kernel(mean_ref, inv_std_ref, x_ref, o_ref):
    """Pass 2: o = (x - mean) * inv_std, NaN -> 0.  No per-element divides."""
    x = x_ref[...]                                   # (C, R_TILE, 128)
    y = (x - mean_ref[...]) * inv_std_ref[...]       # (C, 1, 1) broadcast
    o_ref[...] = jnp.where(jnp.isnan(x), 0.0, y)


def preprocessing(x, *, max_tile_rows=_MAX_TILE_ROWS, channel_major_out=False):
    """Pallas equivalent of Preprocessing.forward.

    Returns (B, M, 3) float32 by default (the module's contract).  Pass
    channel_major_out=True to get the channel-major (B, 3, M) result instead
    and skip the final lane-sparse transpose.
    """
    B = x.shape[0]
    C = _C
    xf = x.astype(jnp.float32)
    M = int(np.prod(x.shape[1:])) // C

    r = pl.cdiv(M, _LANE)                            # rows of 128 lanes needed
    r_tile = min(int(max_tile_rows), _round_up(r, _SUBLANE))
    r_tile = _round_up(r_tile, _SUBLANE)
    r_pad = _round_up(r, r_tile)
    m_pad = r_pad * _LANE

    if (x.ndim == 4 and x.shape[1] == C and x.shape[3] == _LANE
            and x.shape[2] == r_pad):
        # (B, 3, H, 128) with H already tile-aligned: the packed layout is the
        # input's physical layout -> zero-copy.
        x_packed = xf
    else:
        x3 = xf.reshape(B, C, M)
        if m_pad != M:
            # NaN padding: ignored by the stats pass, zeroed by pass 2, and
            # sliced off at the end.  Pad + reshape fuse into one copy.
            x3 = jnp.pad(x3, ((0, 0), (0, 0), (0, m_pad - M)),
                         constant_values=float("nan"))
        x_packed = x3.reshape(B, C, r_pad, _LANE)

    grid = (B, r_pad // r_tile)
    x_spec = pl.BlockSpec((None, C, r_tile, _LANE), lambda b, m: (b, 0, m, 0))

    # ---------------- pass 1: per-batch partial (sum, sum_sq, count) ----------
    part_spec = pl.BlockSpec((None, C, _LANE), lambda b, m: (b, 0, 0))
    part_shape = jax.ShapeDtypeStruct((B, C, _LANE), jnp.float32)
    psum, psq, pcnt = pl.pallas_call(
        _stats_kernel,
        out_shape=(part_shape, part_shape, part_shape),
        grid=grid,
        in_specs=[x_spec],
        out_specs=(part_spec, part_spec, part_spec),
        compiler_params=pltpu.CompilerParams(
            dimension_semantics=("parallel", "arbitrary")),
    )(x_packed)

    # Tiny partial combine + stats math in XLA (a few hundred floats).
    total = jnp.sum(psum, axis=(0, 2))               # (C,)
    total_sq = jnp.sum(psq, axis=(0, 2))
    count = jnp.sum(pcnt, axis=(0, 2))
    mean = total / count
    var = total_sq / count - mean * mean             # population (unbiased=False)
    inv_std = 1.0 / jnp.sqrt(var)                    # std==0 / all-NaN -> inf/NaN, as in PyTorch
    mean_c = mean.reshape(C, 1, 1)
    inv_std_c = inv_std.reshape(C, 1, 1)

    # ---------------- pass 2: normalize + NaN -> 0 ----------------------------
    stat_spec = pl.BlockSpec((C, 1, 1), lambda b, m: (0, 0, 0))
    y_packed = pl.pallas_call(
        _normalize_kernel,
        out_shape=jax.ShapeDtypeStruct((B, C, r_pad, _LANE), jnp.float32),
        grid=grid,
        in_specs=[stat_spec, stat_spec, x_spec],
        out_specs=x_spec,
        compiler_params=pltpu.CompilerParams(
            dimension_semantics=("parallel", "parallel")),
    )(mean_c, inv_std_c, x_packed)

    y = y_packed.reshape(B, C, m_pad)[:, :, :M]      # channel-major (B, 3, M)
    if channel_major_out:
        return y
    # Module's (B, M, 3) contract: one lane-sparse transpose, kept in XLA
    # outside the kernel.  Prefer channel_major_out=True downstream to avoid
    # this extra HBM traversal.
    return jnp.transpose(y, (0, 2, 1))


def _reference(x):
    # Pure-JAX reference (NaN rows assumed aligned across the 3 channels, as
    # required by the original module's boolean-index + view(-1, 3)).
    B = x.shape[0]
    xp = jnp.transpose(x.reshape(B, 3, -1), (0, 2, 1)).astype(jnp.float32)
    flat = xp.reshape(-1, 3)
    mean = jnp.nanmean(flat, axis=0)
    std = jnp.sqrt(jnp.nanmean((flat - mean) ** 2, axis=0))     # unbiased=False
    return jnp.nan_to_num((xp - mean) / std, nan=0.0)


if __name__ == "__main__":
    key = jax.random.PRNGKey(0)
    k1, k2 = jax.random.split(key)

    # Case 1: (2, 3, 16, 16) -> M = 256; exercises the NaN-padding pack path.
    x1 = jax.random.normal(k1, (2, 3, 16, 16), dtype=jnp.float32) * 2.0 + 1.0
    # NaNs aligned across the channel axis (whole keypoints missing), as the
    # original module's view(-1, 3) requires.
    x1 = x1.at[0, :, 2, 1].set(jnp.nan)
    x1 = x1.at[1, :, 5, 3].set(jnp.nan)
    x1 = x1.at[1, :, 0, 0].set(jnp.nan)

    out1 = jax.block_until_ready(jax.jit(preprocessing)(x1))
    np.testing.assert_allclose(np.asarray(out1), np.asarray(_reference(x1)),
                               rtol=1e-4, atol=1e-5)
    assert out1.shape == (2, 16 * 16, 3)

    # Case 2: (2, 3, 16, 128) -> lane-aligned input; exercises the zero-copy
    # packed fast path (no pre-kernel relayout).
    x2 = jax.random.normal(k2, (2, 3, 16, 128), dtype=jnp.float32) * 0.7 + 0.3
    x2 = x2.at[0, :, 7, 100].set(jnp.nan)
    x2 = x2.at[1, :, 11, 5].set(jnp.nan)

    out2 = jax.block_until_ready(jax.jit(preprocessing)(x2))
    np.testing.assert_allclose(np.asarray(out2), np.asarray(_reference(x2)),
                               rtol=1e-4, atol=1e-5)
    assert out2.shape == (2, 16 * 128, 3)

    print("KERNEL_OK")
</pallas_src>

<mosaic_0001>
module attributes {stable_mosaic.version = 11 : i64} {
  func.func @_stats_kernel(%arg0: i32, %arg1: i32, %arg2: memref<1x3x8x128xf32, #tpu.memory_space<vmem>>, %arg3: memref<1x3x128xf32, #tpu.memory_space<vmem>>, %arg4: memref<1x3x128xf32, #tpu.memory_space<vmem>>, %arg5: memref<1x3x128xf32, #tpu.memory_space<vmem>>) attributes {dimension_semantics = [#tpu.dimension_semantics<parallel>, #tpu.dimension_semantics<arbitrary>], iteration_bounds = array<i64: 2, 1>, scalar_prefetch = 0 : i64, scratch_operands = 0 : i64, tpu.core_type = #tpu.core_type<tc>, window_params = [{transform_indices = @transform_0, window_bounds = array<i64: 1, 3, 8, 128>}, {transform_indices = @transform_1, window_bounds = array<i64: 1, 3, 128>}, {transform_indices = @transform_2, window_bounds = array<i64: 1, 3, 128>}, {transform_indices = @transform_3, window_bounds = array<i64: 1, 3, 128>}]} {
    %c0_i32 = arith.constant 0 : i32
    %0 = arith.cmpi eq, %arg1, %c0_i32 : i32
    %1 = arith.extui %0 : i1 to i32
    %c0_i32_0 = arith.constant 0 : i32
    %2 = arith.cmpi ne, %1, %c0_i32_0 : i32
    scf.if %2 {
      %cst_27 = arith.constant 0.000000e+00 : f32
      %33 = vector.broadcast %cst_27 : f32 to vector<3x128xf32>
      %c0_28 = arith.constant 0 : index
      %c0_29 = arith.constant 0 : index
      %c0_30 = arith.constant 0 : index
      %34 = vector.load %arg3[%c0_28, %c0_29, %c0_30] : memref<1x3x128xf32, #tpu.memory_space<vmem>>, vector<1x3x128xf32>
      %35 = vector.shape_cast %34 : vector<1x3x128xf32> to vector<3x128xf32>
      %36 = vector.shape_cast %33 : vector<3x128xf32> to vector<1x3x128xf32>
      tpu.vector_store %arg3[%c0_28, %c0_29, %c0_30], %36 {strides = array<i32>} : memref<1x3x128xf32, #tpu.memory_space<vmem>>, vector<1x3x128xf32>,
      %cst_31 = arith.constant 0.000000e+00 : f32
      %37 = vector.broadcast %cst_31 : f32 to vector<3x128xf32>
      %c0_32 = arith.constant 0 : index
      %c0_33 = arith.constant 0 : index
      %c0_34 = arith.constant 0 : index
      %38 = vector.load %arg4[%c0_32, %c0_33, %c0_34] : memref<1x3x128xf32, #tpu.memory_space<vmem>>, vector<1x3x128xf32>
      %39 = vector.shape_cast %38 : vector<1x3x128xf32> to vector<3x128xf32>
      %40 = vector.shape_cast %37 : vector<3x128xf32> to vector<1x3x128xf32>
      tpu.vector_store %arg4[%c0_32, %c0_33, %c0_34], %40 {strides = array<i32>} : memref<1x3x128xf32, #tpu.memory_space<vmem>>, vector<1x3x128xf32>,
      %cst_35 = arith.constant 0.000000e+00 : f32
      %41 = vector.broadcast %cst_35 : f32 to vector<3x128xf32>
      %c0_36 = arith.constant 0 : index
      %c0_37 = arith.constant 0 : index
      %c0_38 = arith.constant 0 : index
      %42 = vector.load %arg5[%c0_36, %c0_37, %c0_38] : memref<1x3x128xf32, #tpu.memory_space<vmem>>, vector<1x3x128xf32>
      %43 = vector.shape_cast %42 : vector<1x3x128xf32> to vector<3x128xf32>
      %44 = vector.shape_cast %41 : vector<3x128xf32> to vector<1x3x128xf32>
      tpu.vector_store %arg5[%c0_36, %c0_37, %c0_38], %44 {strides = array<i32>} : memref<1x3x128xf32, #tpu.memory_space<vmem>>, vector<1x3x128xf32>,
    } else {
    }
    %c0 = arith.constant 0 : index
    %c0_1 = arith.constant 0 : index
    %c0_2 = arith.constant 0 : index
    %c0_3 = arith.constant 0 : index
    %3 = vector.load %arg2[%c0, %c0_1, %c0_2, %c0_3] : memref<1x3x8x128xf32, #tpu.memory_space<vmem>>, vector<1x3x8x128xf32>
    %4 = vector.shape_cast %3 : vector<1x3x8x128xf32> to vector<3x8x128xf32>
    %5 = arith.cmpf one, %4, %4 : vector<3x8x128xf32>
    %cst = arith.constant 0.000000e+00 : f32
    %6 = vector.broadcast %cst : f32 to vector<3x8x128xf32>
    %7 = arith.select %5, %6, %4 : vector<3x8x128xi1>, vector<3x8x128xf32>
    %cst_4 = arith.constant 0.000000e+00 : f32
    %cst_5 = arith.constant 1.000000e+00 : f32
    %8 = vector.broadcast %cst_4 : f32 to vector<3x8x128xf32>
    %9 = vector.broadcast %cst_5 : f32 to vector<3x8x128xf32>
    %10 = arith.select %5, %8, %9 : vector<3x8x128xi1>, vector<3x8x128xf32>
    %c0_6 = arith.constant 0 : index
    %c0_7 = arith.constant 0 : index
    %c0_8 = arith.constant 0 : index
    %11 = vector.load %arg3[%c0_6, %c0_7, %c0_8] : memref<1x3x128xf32, #tpu.memory_space<vmem>>, vector<1x3x128xf32>
    %12 = vector.shape_cast %11 : vector<1x3x128xf32> to vector<3x128xf32>
    %cst_9 = arith.constant dense<0.000000e+00> : vector<3x128xf32>
    %13 = vector.multi_reduction <add>, %7, %cst_9 [1] : vector<3x8x128xf32> to vector<3x128xf32>
    %14 = arith.addf %12, %13 : vector<3x128xf32>
    %c0_10 = arith.constant 0 : index
    %c0_11 = arith.constant 0 : index
    %c0_12 = arith.constant 0 : index
    %15 = vector.load %arg3[%c0_10, %c0_11, %c0_12] : memref<1x3x128xf32, #tpu.memory_space<vmem>>, vector<1x3x128xf32>
    %16 = vector.shape_cast %15 : vector<1x3x128xf32> to vector<3x128xf32>
    %17 = vector.shape_cast %14 : vector<3x128xf32> to vector<1x3x128xf32>
    tpu.vector_store %arg3[%c0_10, %c0_11, %c0_12], %17 {strides = array<i32>} : memref<1x3x128xf32, #tpu.memory_space<vmem>>, vector<1x3x128xf32>,
    %c0_13 = arith.constant 0 : index
    %c0_14 = arith.constant 0 : index
    %c0_15 = arith.constant 0 : index
    %18 = vector.load %arg4[%c0_13, %c0_14, %c0_15] : memref<1x3x128xf32, #tpu.memory_space<vmem>>, vector<1x3x128xf32>
    %19 = vector.shape_cast %18 : vector<1x3x128xf32> to vector<3x128xf32>
    %20 = arith.mulf %7, %7 : vector<3x8x128xf32>
    %cst_16 = arith.constant dense<0.000000e+00> : vector<3x128xf32>
    %21 = vector.multi_reduction <add>, %20, %cst_16 [1] : vector<3x8x128xf32> to vector<3x128xf32>
    %22 = arith.addf %19, %21 : vector<3x128xf32>
    %c0_17 = arith.constant 0 : index
    %c0_18 = arith.constant 0 : index
    %c0_19 = arith.constant 0 : index
    %23 = vector.load %arg4[%c0_17, %c0_18, %c0_19] : memref<1x3x128xf32, #tpu.memory_space<vmem>>, vector<1x3x128xf32>
    %24 = vector.shape_cast %23 : vector<1x3x128xf32> to vector<3x128xf32>
    %25 = vector.shape_cast %22 : vector<3x128xf32> to vector<1x3x128xf32>
    tpu.vector_store %arg4[%c0_17, %c0_18, %c0_19], %25 {strides = array<i32>} : memref<1x3x128xf32, #tpu.memory_space<vmem>>, vector<1x3x128xf32>,
    %c0_20 = arith.constant 0 : index
    %c0_21 = arith.constant 0 : index
    %c0_22 = arith.constant 0 : index
    %26 = vector.load %arg5[%c0_20, %c0_21, %c0_22] : memref<1x3x128xf32, #tpu.memory_space<vmem>>, vector<1x3x128xf32>
    %27 = vector.shape_cast %26 : vector<1x3x128xf32> to vector<3x128xf32>
    %cst_23 = arith.constant dense<0.000000e+00> : vector<3x128xf32>
    %28 = vector.multi_reduction <add>, %10, %cst_23 [1] : vector<3x8x128xf32> to vector<3x128xf32>
    %29 = arith.addf %27, %28 : vector<3x128xf32>
    %c0_24 = arith.constant 0 : index
    %c0_25 = arith.constant 0 : index
    %c0_26 = arith.constant 0 : index
    %30 = vector.load %arg5[%c0_24, %c0_25, %c0_26] : memref<1x3x128xf32, #tpu.memory_space<vmem>>, vector<1x3x128xf32>
    %31 = vector.shape_cast %30 : vector<1x3x128xf32> to vector<3x128xf32>
    %32 = vector.shape_cast %29 : vector<3x128xf32> to vector<1x3x128xf32>
    tpu.vector_store %arg5[%c0_24, %c0_25, %c0_26], %32 {strides = array<i32>} : memref<1x3x128xf32, #tpu.memory_space<vmem>>, vector<1x3x128xf32>,
    return
  }
  func.func @transform_0(%arg0: i32, %arg1: i32) -> (i32, i32, i32, i32) {
    %c0_i32 = arith.constant 0 : i32
    %c0_i32_0 = arith.constant 0 : i32
    %c0_i32_1 = arith.constant 0 : i32
    return %arg0, %c0_i32, %arg1, %c0_i32_0 : i32, i32, i32, i32
  }
  func.func @transform_1(%arg0: i32, %arg1: i32) -> (i32, i32, i32) {
    %c0_i32 = arith.constant 0 : i32
    %c0_i32_0 = arith.constant 0 : i32
    %c0_i32_1 = arith.constant 0 : i32
    return %arg0, %c0_i32, %c0_i32_0 : i32, i32, i32
  }
  func.func @transform_2(%arg0: i32, %arg1: i32) -> (i32, i32, i32) {
    %c0_i32 = arith.constant 0 : i32
    %c0_i32_0 = arith.constant 0 : i32
    %c0_i32_1 = arith.constant 0 : i32
    return %arg0, %c0_i32, %c0_i32_0 : i32, i32, i32
  }
  func.func @transform_3(%arg0: i32, %arg1: i32) -> (i32, i32, i32) {
    %c0_i32 = arith.constant 0 : i32
    %c0_i32_0 = arith.constant 0 : i32
    %c0_i32_1 = arith.constant 0 : i32
    return %arg0, %c0_i32, %c0_i32_0 : i32, i32, i32
  }
}

module attributes {stable_mosaic.version = 11 : i64} {
  func.func @_normalize_kernel(%arg0: i32, %arg1: i32, %arg2: memref<3x1x1xf32, #tpu.memory_space<vmem>>, %arg3: memref<3x1x1xf32, #tpu.memory_space<vmem>>, %arg4: memref<1x3x8x128xf32, #tpu.memory_space<vmem>>, %arg5: memref<1x3x8x128xf32, #tpu.memory_space<vmem>>) attributes {dimension_semantics = [#tpu.dimension_semantics<parallel>, #tpu.dimension_semantics<parallel>], iteration_bounds = array<i64: 2, 1>, scalar_prefetch = 0 : i64, scratch_operands = 0 : i64, tpu.core_type = #tpu.core_type<tc>, window_params = [{pipeline_mode = #tpu.pipeline_mode<synchronous>, transform_indices = @transform_0, window_bounds = array<i64: 3, 1, 1>}, {pipeline_mode = #tpu.pipeline_mode<synchronous>, transform_indices = @transform_1, window_bounds = array<i64: 3, 1, 1>}, {transform_indices = @transform_2, window_bounds = array<i64: 1, 3, 8, 128>}, {transform_indices = @transform_3, window_bounds = array<i64: 1, 3, 8, 128>}]} {
    %c0 = arith.constant 0 : index
    %c0_0 = arith.constant 0 : index
    %c0_1 = arith.constant 0 : index
    %c0_2 = arith.constant 0 : index
    %0 = vector.load %arg4[%c0, %c0_0, %c0_1, %c0_2] : memref<1x3x8x128xf32, #tpu.memory_space<vmem>>, vector<1x3x8x128xf32>
    %1 = vector.shape_cast %0 : vector<1x3x8x128xf32> to vector<3x8x128xf32>
    %c0_3 = arith.constant 0 : index
    %c0_4 = arith.constant 0 : index
    %c0_5 = arith.constant 0 : index
    %2 = vector.load %arg2[%c0_3, %c0_4, %c0_5] : memref<3x1x1xf32, #tpu.memory_space<vmem>>, vector<3x1x1xf32>
    %3 = vector.broadcast %2 : vector<3x1x1xf32> to vector<3x8x128xf32>
    %4 = arith.subf %1, %3 : vector<3x8x128xf32>
    %c0_6 = arith.constant 0 : index
    %c0_7 = arith.constant 0 : index
    %c0_8 = arith.constant 0 : index
    %5 = vector.load %arg3[%c0_6, %c0_7, %c0_8] : memref<3x1x1xf32, #tpu.memory_space<vmem>>, vector<3x1x1xf32>
    %6 = vector.broadcast %5 : vector<3x1x1xf32> to vector<3x8x128xf32>
    %7 = arith.mulf %4, %6 : vector<3x8x128xf32>
    %8 = arith.cmpf one, %1, %1 : vector<3x8x128xf32>
    %cst = arith.constant 0.000000e+00 : f32
    %9 = vector.broadcast %cst : f32 to vector<3x8x128xf32>
    %10 = arith.select %8, %9, %7 : vector<3x8x128xi1>, vector<3x8x128xf32>
    %c0_9 = arith.constant 0 : index
    %c0_10 = arith.constant 0 : index
    %c0_11 = arith.constant 0 : index
    %c0_12 = arith.constant 0 : index
    %11 = vector.load %arg5[%c0_9, %c0_10, %c0_11, %c0_12] : memref<1x3x8x128xf32, #tpu.memory_space<vmem>>, vector<1x3x8x128xf32>
    %12 = vector.shape_cast %11 : vector<1x3x8x128xf32> to vector<3x8x128xf32>
    %13 = vector.shape_cast %10 : vector<3x8x128xf32> to vector<1x3x8x128xf32>
    tpu.vector_store %arg5[%c0_9, %c0_10, %c0_11, %c0_12], %13 {strides = array<i32>} : memref<1x3x8x128xf32, #tpu.memory_space<vmem>>, vector<1x3x8x128xf32>,
    return
  }
  func.func @transform_0(%arg0: i32, %arg1: i32) -> (i32, i32, i32) {
    %c0_i32 = arith.constant 0 : i32
    %c0_i32_0 = arith.constant 0 : i32
    %c0_i32_1 = arith.constant 0 : i32
    %c0_i32_2 = arith.constant 0 : i32
    return %c0_i32, %c0_i32_0, %c0_i32_1 : i32, i32, i32
  }
  func.func @transform_1(%arg0: i32, %arg1: i32) -> (i32, i32, i32) {
    %c0_i32 = arith.constant 0 : i32
    %c0_i32_0 = arith.constant 0 : i32
    %c0_i32_1 = arith.constant 0 : i32
    %c0_i32_2 = arith.constant 0 : i32
    return %c0_i32, %c0_i32_0, %c0_i32_1 : i32, i32, i32
  }
  func.func @transform_2(%arg0: i32, %arg1: i32) -> (i32, i32, i32, i32) {
    %c0_i32 = arith.constant 0 : i32
    %c0_i32_0 = arith.constant 0 : i32
    %c0_i32_1 = arith.constant 0 : i32
    return %arg0, %c0_i32, %arg1, %c0_i32_0 : i32, i32, i32, i32
  }
  func.func @transform_3(%arg0: i32, %arg1: i32) -> (i32, i32, i32, i32) {
    %c0_i32 = arith.constant 0 : i32
    %c0_i32_0 = arith.constant 0 : i32
    %c0_i32_1 = arith.constant 0 : i32
    return %arg0, %c0_i32, %arg1, %c0_i32_0 : i32, i32, i32, i32
  }
}

</mosaic_0001>

<bundles_post_ra>
// kernel: preprocessing.3
= control target key start
LH: loop header
LB: loop body
LE: loop exit
PB: predicated region body
PF: predicated region fallthrough
CT: control target
= control target key end

     0   :  { %s451_s12 = smov 0   ;;  %s453_s13 = smov 0   ;;  %s502_s0 = inlined_call_operand.vmem [shape: f32[3,1,1], index: 0, kind: input, shape index: {}]   ;;  %s503_s1 = inlined_call_operand.vmem [shape: f32[3,1,1], index: 1, kind: input, shape index: {}]   ;;  %s504_s2 = inlined_call_operand.vmem [shape: f32[2,3,8,128], index: 2, kind: input, shape index: {}]   ;;  %s505_s3 = inlined_call_operand.vmem [shape: f32[2,3,8,128], index: 3, kind: output, shape index: {}]  }
   0x1   :  { %s455_s14 = smov 0  }
   0x2 LB: > { %s25_s15 = sadd.s32 1, %s424_s13  ;;  %p367_p0 = scmp.ge.s32.totalorder %s428_s14, 1  ;;  %s428_s14 = sphi %s455_s14, %s13_s14   ;;  %s424_s13 = sphi %s453_s13, %s507_s13   ;;  %s420_s12 = sphi %s451_s12, %s506_s12  }
   0x3   : > { %p27_p1 = scmp.ge.s32.totalorder %s25_s15, 2  ;;  %p156_p2 = scmp.lt.s32.totalorder %s428_s14, 3 }
   0x5   : > { %s509_s15 = smov (%p27_p1, %s25_s15), 0  ;;  %p157_p3 = pnand %p367_p0, %p156_p2 }
   0x6   : > { %v372_v0 = vld [vmem:[%s502_s0 + $0x2] ss:$0 sm:$0xff] (!%p157_p3)  ;;  %v370_v1 = vld [vmem:[%s502_s0] ss:$0 sm:$0xff] (!%p157_p3)  ;;  %v430_v2 = vmov (!%p157_p3), 0   ;;  %p186_p4 = scmp.lt.s32.totalorder (!%p157_p3), %s420_s12, 1 }
   0x7   : > { %160 = sbr.rel (%p157_p3) target bundleno = 148 (0x94), region = 32  ;;  %405 = vset.pattern.permute.xlu1 (!%p157_p3), %v430_v2  ;;  %404 = vset.pattern.permute.xlu0 (!%p157_p3), %v430_v2  ;;  %v373_v3 = vld [vmem:[%s503_s1] ss:$0 sm:$0xff] (!%p157_p3)  ;;  %v371_v4 = vld [vmem:[%s502_s0 + $0x1] ss:$0 sm:$0xff] (!%p157_p3) }
   0x8   : > { %232 = vperm.xlu1 (!%p157_p3), %405, %v372_v0   ;;  %224 = vperm.xlu0 (!%p157_p3), %404, %v370_v1   ;;  %v375_v5 = vld [vmem:[%s503_s1 + $0x2] ss:$0 sm:$0xff] (!%p157_p3)  ;;  %v374_v6 = vld [vmem:[%s503_s1 + $0x1] ss:$0 sm:$0xff] (!%p157_p3) }
   0xc   : > { %257 = vperm.xlu1 (!%p157_p3), %405, %v373_v3   ;;  %228 = vperm.xlu0 (!%p157_p3), %404, %v371_v4  }
   0xe   : > { %s511_s12 = smov (!%p186_p4, %s420_s12), 1 }
   0xf   : > { %s378_s28 = smul.u32 24, %s511_s12 }
  0x10   : > { %265 = vperm.xlu1 %405, %v375_v5   ;;  %261 = vperm.xlu0 %404, %v374_v6  }
  0x11   : > { %s193_s4 = scalar_lea.vmem %s504_s2, %s378_s28  ;;  %s201_s7 = scalar_lea.vmem %s505_s3, %s378_s28 }
  0x12   : > { %v202_v9 = vld [vmem:[%s193_s4] sm:$0xff]  ;;  %v204_v11 = vld [vmem:[%s193_s4 + $0x10] sm:$0xff]  ;;  %v203_v14 = vld [vmem:[%s193_s4 + $0x8] sm:$0xff] }
  0x13   : > { %vm271_vm0 = vcmp.ne.f32.partialorder %v202_v9, %v202_v9  ;;  %vm273_vm1 = vcmp.ne.f32.partialorder %v204_v11, %v204_v11  ;;  %vm272_vm2 = vcmp.ne.f32.partialorder %v203_v14, %v203_v14 }
  0x87   : > { %v233_v7 = vpop.permute.xlu1 %232  ;;  %v225_v8 = vpop.permute.xlu0 %224 }
  0x88   : > { %v235_v10 = vsub.f32 %v202_v9, %v225_v8  ;;  %v237_v16 = vsub.f32 %v204_v11, %v233_v7 }
  0x8b   : > { %v258_v12 = vpop.permute.xlu1 %257  ;;  %v229_v13 = vpop.permute.xlu0 %228 }
  0x8c   : > { %v268_v15 = vmul.f32 %v258_v12, %v235_v10  ;;  %v236_v18 = vsub.f32 %v203_v14, %v229_v13 }
  0x8e   : > { %v274_v17 = vsel %vm271_vm0, 0.0, %v268_v15 }
  0x8f   : > { %277 = vst [vmem:[%s201_s7] sm:$0xff] %v274_v17  ;;  %v266_v19 = vpop.permute.xlu1 %265  ;;  %v262_v20 = vpop.permute.xlu0 %261 }
  0x90   : > { %v270_v21 = vmul.f32 %v266_v19, %v237_v16  ;;  %v269_v22 = vmul.f32 %v262_v20, %v236_v18 }
  0x92   : > { %v276_v23 = vsel %vm273_vm1, 0.0, %v270_v21  ;;  %v275_v24 = vsel %vm272_vm2, 0.0, %v269_v22 }
  0x93   : > { %279 = vst [vmem:[%s201_s7 + $0x10] sm:$0xff] %v276_v23  ;;  %278 = vst [vmem:[%s201_s7 + $0x8] sm:$0xff] %v275_v24 }
  0x94 PF: > { %s13_s14 = sadd.s32 1, %s428_s14   ;;  %s506_s12 = smov %s424_s13 }
  0x95   : > { %p10_p5 = scmp.ge.s32.totalorder %s13_s14, 4   ;;  %s507_s13 = smov %s509_s15 }
  0x97   :  { %12 = sbr.rel (!%p10_p5) target bundleno = 2 (0x2), region = 62 }

// kernel: preprocessing.2
= control target key start
LH: loop header
LB: loop body
LE: loop exit
PB: predicated region body
PF: predicated region fallthrough
CT: control target
= control target key end

     0   :  { %s531_s12 = smov 0   ;;  %s533_s13 = smov 0   ;;  %s591_s0 = inlined_call_operand.vmem [shape: f32[2,3,8,128], index: 0, kind: input, shape index: {}]   ;;  %s592_s1 = inlined_call_operand.vmem [shape: f32[2,3,128], index: 1, kind: output, shape index: {0}]   ;;  %s593_s2 = inlined_call_operand.vmem [shape: f32[2,3,128], index: 2, kind: output, shape index: {1}]   ;;  %s594_s3 = inlined_call_operand.vmem [shape: f32[2,3,128], index: 3, kind: output, shape index: {2}]  }
   0x1   :  { %s535_s14 = smov 0  }
   0x2 LB: > { %s26_s15 = sadd.s32 1, %s503_s13  ;;  %p451_p0 = scmp.ge.s32.totalorder %s507_s14, 1  ;;  %s507_s14 = sphi %s535_s14, %s14_s14   ;;  %s503_s13 = sphi %s533_s13, %s596_s13   ;;  %s499_s12 = sphi %s531_s12, %s595_s12  }
   0x3   : > { %p28_p1 = scmp.ge.s32.totalorder %s26_s15, 2  ;;  %p159_p2 = scmp.lt.s32.totalorder %s507_s14, 3 }
   0x5   : > { %s598_s15 = smov (%p28_p1, %s26_s15), 0  ;;  %p160_p3 = pnand %p451_p0, %p159_p2 }
   0x6   : > { %p193_p4 = scmp.lt.s32.totalorder (!%p160_p3), %s499_s12, 1  ;;  %v509_v0 = vmov (!%p160_p3), 0.0   ;;  %v510_v7 = vmov (!%p160_p3), 1.0   ;;  %vm254_vm3 = vcmask (!%p160_p3), 1041409   ;;  %vm256_vm4 = vcmask (!%p160_p3), 1042434  }
   0x7   : > { %163 = sbr.rel (%p160_p3) target bundleno = 45 (0x2d), region = 24 }
   0xe   : > { %s600_s12 = smov (!%p193_p4, %s499_s12), 1 }
   0xf   : > { %s458_s16 = smul.u32 24, %s600_s12  ;;  %s453_s17 = sshll.u32 %s600_s12, 2 }
  0x10   : > { %s552_s20 = scalar_lea.vmem %s592_s1, %s453_s17  ;;  %s557_s23 = scalar_lea.vmem %s593_s2, %s453_s17 }
  0x11   : > { %s200_s26 = scalar_lea.vmem %s591_s0, %s458_s16  ;;  %217 = vst [vmem:[%s552_s20] sm:$0x7] %v509_v0  ;;  %218 = vst [vmem:[%s557_s23] sm:$0x7] %v509_v0  ;;  %s567_s29 = scalar_lea.vmem %s594_s3, %s453_s17 }
  0x12   : > { %v220_v1 = vld [vmem:[%s200_s26] sm:$0xff]  ;;  %v221_v2 = vld [vmem:[%s200_s26 + $0x8] sm:$0xff]  ;;  %v222_v3 = vld [vmem:[%s200_s26 + $0x10] sm:$0xff]  ;;  %219 = vst [vmem:[%s567_s29] sm:$0x7] %v509_v0 }
  0x13   : > { %vm223_vm0 = vcmp.ne.f32.partialorder %v220_v1, %v220_v1  ;;  %vm224_vm1 = vcmp.ne.f32.partialorder %v221_v2, %v221_v2  ;;  %vm225_vm2 = vcmp.ne.f32.partialorder %v222_v3, %v222_v3 }
  0x14   : > { %v226_v4 = vsel %vm223_vm0, 0.0, %v220_v1  ;;  %v227_v5 = vsel %vm224_vm1, 0.0, %v221_v2  ;;  %v228_v6 = vsel %vm225_vm2, 0.0, %v222_v3  ;;  %v229_v8 = vsel %vm223_vm0, 0.0, %v510_v7 }
  0x15   : > { %v230_v9 = vsel %vm224_vm1, 0.0, %v510_v7  ;;  %v231_v10 = vsel %vm225_vm2, 0.0, %v510_v7  ;;  %v233_v11 = vrot.slane %v226_v4, 4  ;;  %v239_v12 = vrot.slane %v227_v5, 4 }
  0x16   : > { %v245_v13 = vrot.slane %v228_v6, 4  ;;  %v262_v14 = vmul.f32 %v226_v4, %v226_v4  ;;  %v263_v15 = vmul.f32 %v227_v5, %v227_v5  ;;  %v264_v16 = vmul.f32 %v228_v6, %v228_v6 }
  0x17   : > { %v234_v17 = vadd.f32 %v233_v11, %v226_v4  ;;  %v240_v18 = vadd.f32 %v239_v12, %v227_v5  ;;  %v292_v19 = vrot.slane %v229_v8, 4  ;;  %v298_v20 = vrot.slane %v230_v9, 4 }
  0x18   : > { %v265_v21 = vrot.slane %v262_v14, 4  ;;  %v271_v22 = vrot.slane %v263_v15, 4  ;;  %v304_v23 = vrot.slane %v231_v10, 4  ;;  %v246_v24 = vadd.f32 %v245_v13, %v228_v6  ;;  %v232_v53 = vld [vmem:[%s552_s20] sm:$0x7] }
  0x19   : > { %v235_v25 = vrot.slane %v234_v17, 2  ;;  %v241_v26 = vrot.slane %v240_v18, 2  ;;  %v293_v27 = vadd.f32 %v292_v19, %v229_v8  ;;  %v299_v28 = vadd.f32 %v298_v20, %v230_v9  ;;  %v261_v7 = vld [vmem:[%s557_s23] sm:$0x7] }
  0x1a   : > { %v266_v29 = vadd.f32 %v265_v21, %v262_v14  ;;  %v272_v30 = vadd.f32 %v271_v22, %v263_v15  ;;  %v305_v31 = vadd.f32 %v304_v23, %v231_v10  ;;  %v247_v32 = vrot.slane %v246_v24, 2  ;;  %v291_v10 = vld [vmem:[%s567_s29] sm:$0x7] }
  0x1b   : > { %v294_v33 = vrot.slane %v293_v27, 2  ;;  %v300_v34 = vrot.slane %v299_v28, 2  ;;  %v236_v35 = vadd.f32 %v235_v25, %v234_v17  ;;  %v242_v36 = vadd.f32 %v241_v26, %v240_v18 }
  0x1c   : > { %v248_v37 = vadd.f32 %v247_v32, %v246_v24  ;;  %v267_v38 = vrot.slane %v266_v29, 2  ;;  %v273_v39 = vrot.slane %v272_v30, 2  ;;  %v277_v40 = vrot.slane %v264_v16, 4 }
  0x1d   : > { %v237_v41 = vrot.slane %v236_v35, 1  ;;  %v243_v42 = vrot.slane %v242_v36, 1  ;;  %v295_v43 = vadd.f32 %v294_v33, %v293_v27  ;;  %v301_v44 = vadd.f32 %v300_v34, %v299_v28 }
  0x1e   : > { %v249_v45 = vrot.slane %v248_v37, 1  ;;  %v268_v46 = vadd.f32 %v267_v38, %v266_v29  ;;  %v274_v47 = vadd.f32 %v273_v39, %v272_v30  ;;  %v278_v48 = vadd.f32 %v277_v40, %v264_v16 }
  0x1f   : > { %v238_v49 = vadd.f32 %v237_v41, %v236_v35  ;;  %v244_v50 = vadd.f32 %v243_v42, %v242_v36  ;;  %v296_v51 = vrot.slane %v295_v43, 1  ;;  %v302_v52 = vrot.slane %v301_v44, 1 }
  0x20   : > { %v250_v54 = vadd.f32 %v249_v45, %v248_v37  ;;  %v269_v55 = vrot.slane %v268_v46, 1  ;;  %v275_v56 = vrot.slane %v274_v47, 1  ;;  %v279_v57 = vrot.slane %v278_v48, 2 }
  0x21   : > { %v255_v58 = vsel %vm254_vm3, %v244_v50, %v238_v49  ;;  %v297_v59 = vadd.f32 %v296_v51, %v295_v43  ;;  %v303_v60 = vadd.f32 %v302_v52, %v301_v44  ;;  %v306_v61 = vrot.slane %v305_v31, 2 }
  0x22   : > { %v257_v62 = vsel %vm256_vm4, %v250_v54, %v255_v58  ;;  %v270_v63 = vadd.f32 %v269_v55, %v268_v46  ;;  %v276_v0 = vadd.f32 %v275_v56, %v274_v47  ;;  %v280_v1 = vadd.f32 %v279_v57, %v278_v48 }
  0x23   : > { %v259_v2 = vadd.f32 %v257_v62, %v232_v53  ;;  %v307_v3 = vadd.f32 %v306_v61, %v305_v31  ;;  %v313_v9 = vsel %vm254_vm3, %v303_v60, %v297_v59 }
  0x24   : > { %v281_v4 = vrot.slane %v280_v1, 1  ;;  %v286_v5 = vsel %vm254_vm3, %v276_v0, %v270_v63 }
  0x25   : > { %260 = vst [vmem:[%s552_s20] sm:$0x7] %v259_v2  ;;  %v308_v6 = vrot.slane %v307_v3, 1 }
  0x26   : > { %v282_v8 = vadd.f32 %v281_v4, %v280_v1 }
  0x27   : > { %v309_v11 = vadd.f32 %v308_v6, %v307_v3 }
  0x28   : > { %v287_v12 = vsel %vm256_vm4, %v282_v8, %v286_v5 }
  0x29   : > { %v289_v13 = vadd.f32 %v287_v12, %v261_v7  ;;  %v314_v14 = vsel %vm256_vm4, %v309_v11, %v313_v9 }
  0x2a   : > { %v316_v15 = vadd.f32 %v314_v14, %v291_v10 }
  0x2b   : > { %290 = vst [vmem:[%s557_s23] sm:$0x7] %v289_v13 }
  0x2c   : > { %317 = vst [vmem:[%s567_s29] sm:$0x7] %v316_v15 }
  0x2d PF: > { %s14_s14 = sadd.s32 1, %s507_s14   ;;  %s595_s12 = smov %s503_s13 }
  0x2e   : > { %p11_p5 = scmp.ge.s32.totalorder %s14_s14, 4   ;;  %s596_s13 = smov %s598_s15 }
  0x30   :  { %13 = sbr.rel (!%p11_p5) target bundleno = 2 (0x2), region = 82 }

</bundles_post_ra>
